<compile_context>
chip_gen: v5e
topology: v5e:2x2
jax: 0.10.0
libtpu: 0.0.40
codegen_flags: <defaults>
</compile_context>

<pallas_src>
import functools
import numpy as np
import jax
import jax.numpy as jnp
from jax import lax
from jax.experimental import pallas as pl
from jax.experimental.pallas import tpu as pltpu


def _layernorm(x, g, b, eps=1e-5):
    mu = jnp.mean(x, axis=-1, keepdims=True)
    var = jnp.mean((x - mu) ** 2, axis=-1, keepdims=True)
    return (x - mu) * lax.rsqrt(var + eps) * g + b


def transformer_block_kernel(x_ref, mask_ref, ln1g_ref, ln1b_ref,
                             wqkv_ref,
                             ln2g_ref, ln2b_ref,
                             w1_ref, b1_ref, w2_ref, b2_ref,
                             o_ref, mha_ref, *, num_heads, compute_dtype):
    f32 = jnp.float32
    rows, D = x_ref.shape                       # rows = b_block * T
    T = mask_ref.shape[0]
    Bblk = rows // T
    H = num_heads
    dph = D // H
    c = lambda a: a.astype(compute_dtype)       # matmul-operand cast (f32 or bf16)

    x1 = x_ref[...].astype(f32)                 # (rows, D)

    # --- LayerNorm 1 ---
    xn1 = _layernorm(x1, ln1g_ref[...], ln1b_ref[...])

    # --- Fused Q/K/V projection: one (rows, D) @ (D, 3D) contraction.
    #     Per-head weights are block-diagonal inside each D-wide slab;
    #     1/sqrt(dph) is pre-folded into the V slab on the host. ---
    qkv = jnp.dot(c(xn1), c(wqkv_ref[...]), preferred_element_type=f32)  # (rows, 3D)
    q = qkv[:, 0 * D:1 * D].reshape(Bblk, T, D)
    k = qkv[:, 1 * D:2 * D].reshape(Bblk, T, D)
    v = qkv[:, 2 * D:3 * D].reshape(Bblk, T, D)

    bias = mask_ref[...][None]                  # (1, T, T) additive causal bias

    # --- Per-head causal attention; batched over Bblk, head outputs written
    #     straight into the (rows, D) VMEM scratch slice (no concat). ---
    # TODO(synk): dropout on attention weights omitted (eval-mode identity).
    for h in range(H):                          # small static loop
        sl = slice(h * dph, (h + 1) * dph)
        s = jnp.einsum('bqd,bkd->bqk', c(q[:, :, sl]), c(k[:, :, sl]),
                       preferred_element_type=f32) + bias        # (Bblk, T, T)
        m = jnp.max(s, axis=-1, keepdims=True)
        p = jnp.exp(s - m)
        l = jnp.sum(p, axis=-1, keepdims=True)
        o_h = jnp.einsum('bqk,bkd->bqd', c(p), c(v[:, :, sl]),
                         preferred_element_type=f32)             # (Bblk, T, dph)
        # Normalize after P@V (fewer elements); EUP reciprocal.
        o_h = o_h * pl.reciprocal(l, approx=True)
        mha_ref[:, sl] = o_h.reshape(rows, dph)

    x2 = mha_ref[...] + x1                      # residual 1

    # --- LayerNorm 2 + FeedForward (Linear->ReLU->Linear->ReLU) ---
    xn2 = _layernorm(x2, ln2g_ref[...], ln2b_ref[...])
    h1 = jnp.maximum(
        jnp.dot(c(xn2), c(w1_ref[...]), preferred_element_type=f32) + b1_ref[...], 0.0)
    h2 = jnp.maximum(
        jnp.dot(c(h1), c(w2_ref[...]), preferred_element_type=f32) + b2_ref[...], 0.0)

    o_ref[...] = (h2 + x2).astype(o_ref.dtype)  # residual 2


def _block_diag(w):
    """(H, dph, dph) per-head weights -> (D, D) block-diagonal weight."""
    H, dph, _ = w.shape
    d = H * dph
    out = jnp.zeros((d, d), w.dtype)
    for h in range(H):
        out = out.at[h * dph:(h + 1) * dph, h * dph:(h + 1) * dph].set(w[h])
    return out


def _pick_b_block(B):
    # Pack as many batch rows per grid step as possible (amortize per-step
    # overhead); for larger B keep >= 2 steps so the "parallel" batch axis can
    # shard across v7x's two TensorCores.
    if B <= 2:
        return B
    for cand in range(B // 2, 0, -1):
        if B % cand == 0:
            return cand
    return 1


def transformer_block(x, params, *, b_block=None, compute_dtype=jnp.float32):
    """x: (B, T, D) float32.  For peak MXU on v6e/v7x pass compute_dtype=jnp.bfloat16."""
    B, T, D = x.shape
    (ln1g, ln1b, wqT, wkT, wvT, ln2g, ln2b, w1T, b1, w2T, b2) = params
    H, dph, _ = wqT.shape

    # Host-side prep: block-diagonal QKV weights fused into one (D, 3D) matrix,
    # attention scale folded into the V slab, additive causal bias.
    scale = 1.0 / (dph ** 0.5)
    wqkv = jnp.concatenate(
        [_block_diag(wqT), _block_diag(wkT), _block_diag(wvT) * scale], axis=1)  # (D, 3D)
    row = jnp.arange(T)[:, None]
    col = jnp.arange(T)[None, :]
    mask_bias = jnp.where(row >= col, 0.0, -1e30).astype(jnp.float32)

    if b_block is None:
        b_block = _pick_b_block(B)
    assert B % b_block == 0
    rows = b_block * T
    grid = (B // b_block,)

    kernel = functools.partial(transformer_block_kernel,
                               num_heads=H, compute_dtype=compute_dtype)
    full = lambda s: pl.BlockSpec(s, lambda i: (0,) * len(s))

    out2d = pl.pallas_call(
        kernel,
        out_shape=jax.ShapeDtypeStruct((B * T, D), x.dtype),
        grid_spec=pltpu.PrefetchScalarGridSpec(
            num_scalar_prefetch=0,
            grid=grid,
            in_specs=[
                pl.BlockSpec((rows, D), lambda i: (i, 0)),       # x rows (B*T fold)
                full((T, T)),                                    # causal additive bias
                full((1, D)), full((1, D)),                      # ln1 gamma/beta
                full((D, 3 * D)),                                # fused block-diag Wqkv
                full((1, D)), full((1, D)),                      # ln2 gamma/beta
                full((D, D)), full((1, D)),                      # W1^T, b1
                full((D, D)), full((1, D)),                      # W2^T, b2
            ],
            out_specs=pl.BlockSpec((rows, D), lambda i: (i, 0)),
            scratch_shapes=[pltpu.VMEM((rows, D), jnp.float32)],  # mha output slab
        ),
        compiler_params=pltpu.CompilerParams(
            dimension_semantics=("parallel",),
            vmem_limit_bytes=32 * 1024 * 1024),
    )(x.reshape(B * T, D), mask_bias, ln1g, ln1b, wqkv,
      ln2g, ln2b, w1T, b1, w2T, b2)
    return out2d.reshape(B, T, D)


def make_params(key, d, num_heads):
    dph = d // num_heads
    ks = jax.random.split(key, 8)
    sc = 0.1
    ln1g = jnp.ones((1, d), jnp.float32)
    ln1b = jnp.zeros((1, d), jnp.float32)
    ln2g = jnp.ones((1, d), jnp.float32)
    ln2b = jnp.zeros((1, d), jnp.float32)
    # PyTorch Linear: y = x @ W^T ; store W^T directly so kernel does x @ w.
    wqT = sc * jax.random.normal(ks[0], (num_heads, dph, dph), jnp.float32)
    wkT = sc * jax.random.normal(ks[1], (num_heads, dph, dph), jnp.float32)
    wvT = sc * jax.random.normal(ks[2], (num_heads, dph, dph), jnp.float32)
    w1T = sc * jax.random.normal(ks[3], (d, d), jnp.float32)
    b1 = sc * jax.random.normal(ks[4], (1, d), jnp.float32)
    w2T = sc * jax.random.normal(ks[5], (d, d), jnp.float32)
    b2 = sc * jax.random.normal(ks[6], (1, d), jnp.float32)
    return (ln1g, ln1b, wqT, wkT, wvT, ln2g, ln2b, w1T, b1, w2T, b2)


def reference(x, params):
    """Pure-JAX mirror of the PyTorch forward (dropout = identity)."""
    (ln1g, ln1b, wqT, wkT, wvT, ln2g, ln2b, w1T, b1, w2T, b2) = params
    B, T, D = x.shape
    H, dph, _ = wqT.shape

    def ln(x, g, b):
        mu = x.mean(-1, keepdims=True)
        var = ((x - mu) ** 2).mean(-1, keepdims=True)
        return (x - mu) / jnp.sqrt(var + 1e-5) * g[0] + b[0]

    xn1 = ln(x, ln1g, ln1b)
    tril = jnp.tril(jnp.ones((T, T)))
    outs = []
    for h in range(H):
        xh = xn1[:, :, h * dph:(h + 1) * dph]
        Q, K, V = xh @ wqT[h], xh @ wkT[h], xh @ wvT[h]
        a = Q @ jnp.swapaxes(K, -2, -1)
        a = jnp.where(tril == 0, -jnp.inf, a)
        a = jax.nn.softmax(a, axis=-1)
        outs.append(a @ V / dph ** 0.5)
    x2 = jnp.concatenate(outs, axis=-1) + x
    xn2 = ln(x2, ln2g, ln2b)
    h1 = jnp.maximum(xn2 @ w1T + b1[0], 0.0)
    h2 = jnp.maximum(h1 @ w2T + b2[0], 0.0)
    return h2 + x2


if __name__ == "__main__":
    B, T, D, H = 2, 8, 32, 4          # block_size = 8, d = 32, num_heads = 4
    key = jax.random.PRNGKey(0)
    kx, kp = jax.random.split(key)
    x = jax.random.normal(kx, (B, T, D), jnp.float32)
    params = make_params(kp, D, H)

    out = transformer_block(x, params)
    out = jax.block_until_ready(out)

    ref = reference(x, params)
    # Tolerance accounts for the approximate EUP reciprocal in the softmax
    # normalization (pl.reciprocal(..., approx=True)); compute stays f32.
    np.testing.assert_allclose(np.asarray(out), np.asarray(ref), rtol=2e-3, atol=2e-3)
    print("KERNEL_OK")
</pallas_src>

<mosaic_0001>
module attributes {stable_mosaic.version = 11 : i64} {
  func.func @transformer_block_kernel(%arg0: i32, %arg1: memref<16x32xf32, #tpu.memory_space<vmem>>, %arg2: memref<8x8xf32, #tpu.memory_space<vmem>>, %arg3: memref<1x32xf32, #tpu.memory_space<vmem>>, %arg4: memref<1x32xf32, #tpu.memory_space<vmem>>, %arg5: memref<32x96xf32, #tpu.memory_space<vmem>>, %arg6: memref<1x32xf32, #tpu.memory_space<vmem>>, %arg7: memref<1x32xf32, #tpu.memory_space<vmem>>, %arg8: memref<32x32xf32, #tpu.memory_space<vmem>>, %arg9: memref<1x32xf32, #tpu.memory_space<vmem>>, %arg10: memref<32x32xf32, #tpu.memory_space<vmem>>, %arg11: memref<1x32xf32, #tpu.memory_space<vmem>>, %arg12: memref<16x32xf32, #tpu.memory_space<vmem>>, %arg13: memref<16x32xf32, #tpu.memory_space<vmem>>) attributes {dimension_semantics = [#tpu.dimension_semantics<parallel>], iteration_bounds = array<i64: 1>, scalar_prefetch = 0 : i64, scratch_operands = 1 : i64, tpu.core_type = #tpu.core_type<tc>, window_params = [{transform_indices = @transform_0, window_bounds = array<i64: 16, 32>}, {pipeline_mode = #tpu.pipeline_mode<synchronous>, transform_indices = @transform_1, window_bounds = array<i64: 8, 8>}, {pipeline_mode = #tpu.pipeline_mode<synchronous>, transform_indices = @transform_2, window_bounds = array<i64: 1, 32>}, {pipeline_mode = #tpu.pipeline_mode<synchronous>, transform_indices = @transform_3, window_bounds = array<i64: 1, 32>}, {pipeline_mode = #tpu.pipeline_mode<synchronous>, transform_indices = @transform_4, window_bounds = array<i64: 32, 96>}, {pipeline_mode = #tpu.pipeline_mode<synchronous>, transform_indices = @transform_5, window_bounds = array<i64: 1, 32>}, {pipeline_mode = #tpu.pipeline_mode<synchronous>, transform_indices = @transform_6, window_bounds = array<i64: 1, 32>}, {pipeline_mode = #tpu.pipeline_mode<synchronous>, transform_indices = @transform_7, window_bounds = array<i64: 32, 32>}, {pipeline_mode = #tpu.pipeline_mode<synchronous>, transform_indices = @transform_8, window_bounds = array<i64: 1, 32>}, {pipeline_mode = #tpu.pipeline_mode<synchronous>, transform_indices = @transform_9, window_bounds = array<i64: 32, 32>}, {pipeline_mode = #tpu.pipeline_mode<synchronous>, transform_indices = @transform_10, window_bounds = array<i64: 1, 32>}, {transform_indices = @transform_11, window_bounds = array<i64: 16, 32>}]} {
    %c0 = arith.constant 0 : index
    %c0_0 = arith.constant 0 : index
    %0 = vector.load %arg1[%c0, %c0_0] : memref<16x32xf32, #tpu.memory_space<vmem>>, vector<16x32xf32>
    %c0_1 = arith.constant 0 : index
    %c0_2 = arith.constant 0 : index
    %1 = vector.load %arg3[%c0_1, %c0_2] : memref<1x32xf32, #tpu.memory_space<vmem>>, vector<1x32xf32>
    %c0_3 = arith.constant 0 : index
    %c0_4 = arith.constant 0 : index
    %2 = vector.load %arg4[%c0_3, %c0_4] : memref<1x32xf32, #tpu.memory_space<vmem>>, vector<1x32xf32>
    %cst = arith.constant dense<0.000000e+00> : vector<16xf32>
    %3 = vector.multi_reduction <add>, %0, %cst [1] : vector<16x32xf32> to vector<16xf32>
    %4 = vector.shape_cast %3 : vector<16xf32> to vector<16x1xf32>
    %cst_5 = arith.constant 3.200000e+01 : f32
    %5 = vector.broadcast %cst_5 : f32 to vector<16x1xf32>
    %6 = arith.divf %4, %5 : vector<16x1xf32>
    %7 = vector.broadcast %6 : vector<16x1xf32> to vector<16x32xf32>
    %8 = arith.subf %0, %7 : vector<16x32xf32>
    %9 = arith.mulf %8, %8 : vector<16x32xf32>
    %cst_6 = arith.constant dense<0.000000e+00> : vector<16xf32>
    %10 = vector.multi_reduction <add>, %9, %cst_6 [1] : vector<16x32xf32> to vector<16xf32>
    %11 = vector.shape_cast %10 : vector<16xf32> to vector<16x1xf32>
    %cst_7 = arith.constant 3.200000e+01 : f32
    %12 = vector.broadcast %cst_7 : f32 to vector<16x1xf32>
    %13 = arith.divf %11, %12 : vector<16x1xf32>
    %14 = vector.broadcast %6 : vector<16x1xf32> to vector<16x32xf32>
    %15 = arith.subf %0, %14 : vector<16x32xf32>
    %cst_8 = arith.constant 9.99999974E-6 : f32
    %16 = vector.broadcast %cst_8 : f32 to vector<16x1xf32>
    %17 = arith.addf %13, %16 : vector<16x1xf32>
    %18 = math.rsqrt %17 : vector<16x1xf32>
    %19 = vector.broadcast %18 : vector<16x1xf32> to vector<16x32xf32>
    %20 = arith.mulf %15, %19 : vector<16x32xf32>
    %21 = vector.broadcast %1 : vector<1x32xf32> to vector<16x32xf32>
    %22 = arith.mulf %20, %21 : vector<16x32xf32>
    %23 = vector.broadcast %2 : vector<1x32xf32> to vector<16x32xf32>
    %24 = arith.addf %22, %23 : vector<16x32xf32>
    %c0_9 = arith.constant 0 : index
    %c0_10 = arith.constant 0 : index
    %25 = vector.load %arg5[%c0_9, %c0_10] : memref<32x96xf32, #tpu.memory_space<vmem>>, vector<32x96xf32>
    %cst_11 = arith.constant dense<0.000000e+00> : vector<16x96xf32>
    %26 = tpu.matmul %24, %25, %cst_11 {dimension_numbers = #tpu.dot_dimension_numbers<[1], [0], [0], [1], [0, 0, 1, 1], [], []>} : vector<16x32xf32>, vector<32x96xf32>, vector<16x96xf32> -> vector<16x96xf32>
    %27 = vector.extract_strided_slice %26 {offsets = [0, 0], sizes = [16, 32], strides = [1, 1]} : vector<16x96xf32> to vector<16x32xf32>
    %28 = vector.shape_cast %27 : vector<16x32xf32> to vector<2x8x32xf32>
    %29 = vector.extract_strided_slice %26 {offsets = [0, 32], sizes = [16, 32], strides = [1, 1]} : vector<16x96xf32> to vector<16x32xf32>
    %30 = vector.shape_cast %29 : vector<16x32xf32> to vector<2x8x32xf32>
    %31 = vector.extract_strided_slice %26 {offsets = [0, 64], sizes = [16, 32], strides = [1, 1]} : vector<16x96xf32> to vector<16x32xf32>
    %32 = vector.shape_cast %31 : vector<16x32xf32> to vector<2x8x32xf32>
    %c0_12 = arith.constant 0 : index
    %c0_13 = arith.constant 0 : index
    %33 = vector.load %arg2[%c0_12, %c0_13] : memref<8x8xf32, #tpu.memory_space<vmem>>, vector<8x8xf32>
    %34 = vector.shape_cast %33 : vector<8x8xf32> to vector<1x8x8xf32>
    %35 = vector.extract_strided_slice %28 {offsets = [0, 0, 0], sizes = [2, 8, 8], strides = [1, 1, 1]} : vector<2x8x32xf32> to vector<2x8x8xf32>
    %36 = vector.extract_strided_slice %30 {offsets = [0, 0, 0], sizes = [2, 8, 8], strides = [1, 1, 1]} : vector<2x8x32xf32> to vector<2x8x8xf32>
    "tpu.trace_start"() <{level = 10 : i32, message = "bqd,bkd->bqk"}> : () -> ()
    %cst_14 = arith.constant dense<0.000000e+00> : vector<2x8x8xf32>
    %37 = tpu.matmul %35, %36, %cst_14 {dimension_numbers = #tpu.dot_dimension_numbers<[2], [2], [1], [1], [0, 0, 0, 1, 1, 1], [0], [0]>} : vector<2x8x8xf32>, vector<2x8x8xf32>, vector<2x8x8xf32> -> vector<2x8x8xf32>
    "tpu.trace_stop"() : () -> ()
    %38 = vector.broadcast %34 : vector<1x8x8xf32> to vector<2x8x8xf32>
    %39 = arith.addf %37, %38 : vector<2x8x8xf32>
    %cst_15 = arith.constant dense<0xFF800000> : vector<2x8xf32>
    %40 = vector.multi_reduction <maximumf>, %39, %cst_15 [2] : vector<2x8x8xf32> to vector<2x8xf32>
    %41 = vector.shape_cast %40 : vector<2x8xf32> to vector<2x8x1xf32>
    %42 = vector.broadcast %41 : vector<2x8x1xf32> to vector<2x8x8xf32>
    %43 = arith.subf %39, %42 : vector<2x8x8xf32>
    %44 = math.exp %43 : vector<2x8x8xf32>
    %cst_16 = arith.constant dense<0.000000e+00> : vector<2x8xf32>
    %45 = vector.multi_reduction <add>, %44, %cst_16 [2] : vector<2x8x8xf32> to vector<2x8xf32>
    %46 = vector.shape_cast %45 : vector<2x8xf32> to vector<2x8x1xf32>
    %47 = vector.extract_strided_slice %32 {offsets = [0, 0, 0], sizes = [2, 8, 8], strides = [1, 1, 1]} : vector<2x8x32xf32> to vector<2x8x8xf32>
    "tpu.trace_start"() <{level = 10 : i32, message = "bqk,bkd->bqd"}> : () -> ()
    %cst_17 = arith.constant dense<0.000000e+00> : vector<2x8x8xf32>
    %48 = tpu.matmul %44, %47, %cst_17 {dimension_numbers = #tpu.dot_dimension_numbers<[2], [1], [1], [2], [0, 0, 0, 1, 1, 2], [0], [0]>} : vector<2x8x8xf32>, vector<2x8x8xf32>, vector<2x8x8xf32> -> vector<2x8x8xf32>
    "tpu.trace_stop"() : () -> ()
    %49 = tpu.reciprocal %46 {approx = true} : vector<2x8x1xf32> -> vector<2x8x1xf32>
    %50 = vector.broadcast %49 : vector<2x8x1xf32> to vector<2x8x8xf32>
    %51 = arith.mulf %48, %50 : vector<2x8x8xf32>
    %52 = vector.shape_cast %51 : vector<2x8x8xf32> to vector<16x8xf32>
    %c0_18 = arith.constant 0 : index
    %c0_19 = arith.constant 0 : index
    %53 = vector.load %arg13[%c0_18, %c0_19] : memref<16x32xf32, #tpu.memory_space<vmem>>, vector<16x8xf32>
    tpu.vector_store %arg13[%c0_18, %c0_19], %52 {strides = array<i32>} : memref<16x32xf32, #tpu.memory_space<vmem>>, vector<16x8xf32>,
    %54 = vector.extract_strided_slice %28 {offsets = [0, 0, 8], sizes = [2, 8, 8], strides = [1, 1, 1]} : vector<2x8x32xf32> to vector<2x8x8xf32>
    %55 = vector.extract_strided_slice %30 {offsets = [0, 0, 8], sizes = [2, 8, 8], strides = [1, 1, 1]} : vector<2x8x32xf32> to vector<2x8x8xf32>
    "tpu.trace_start"() <{level = 10 : i32, message = "bqd,bkd->bqk"}> : () -> ()
    %cst_20 = arith.constant dense<0.000000e+00> : vector<2x8x8xf32>
    %56 = tpu.matmul %54, %55, %cst_20 {dimension_numbers = #tpu.dot_dimension_numbers<[2], [2], [1], [1], [0, 0, 0, 1, 1, 1], [0], [0]>} : vector<2x8x8xf32>, vector<2x8x8xf32>, vector<2x8x8xf32> -> vector<2x8x8xf32>
    "tpu.trace_stop"() : () -> ()
    %57 = vector.broadcast %34 : vector<1x8x8xf32> to vector<2x8x8xf32>
    %58 = arith.addf %56, %57 : vector<2x8x8xf32>
    %cst_21 = arith.constant dense<0xFF800000> : vector<2x8xf32>
    %59 = vector.multi_reduction <maximumf>, %58, %cst_21 [2] : vector<2x8x8xf32> to vector<2x8xf32>
    %60 = vector.shape_cast %59 : vector<2x8xf32> to vector<2x8x1xf32>
    %61 = vector.broadcast %60 : vector<2x8x1xf32> to vector<2x8x8xf32>
    %62 = arith.subf %58, %61 : vector<2x8x8xf32>
    %63 = math.exp %62 : vector<2x8x8xf32>
    %cst_22 = arith.constant dense<0.000000e+00> : vector<2x8xf32>
    %64 = vector.multi_reduction <add>, %63, %cst_22 [2] : vector<2x8x8xf32> to vector<2x8xf32>
    %65 = vector.shape_cast %64 : vector<2x8xf32> to vector<2x8x1xf32>
    %66 = vector.extract_strided_slice %32 {offsets = [0, 0, 8], sizes = [2, 8, 8], strides = [1, 1, 1]} : vector<2x8x32xf32> to vector<2x8x8xf32>
    "tpu.trace_start"() <{level = 10 : i32, message = "bqk,bkd->bqd"}> : () -> ()
    %cst_23 = arith.constant dense<0.000000e+00> : vector<2x8x8xf32>
    %67 = tpu.matmul %63, %66, %cst_23 {dimension_numbers = #tpu.dot_dimension_numbers<[2], [1], [1], [2], [0, 0, 0, 1, 1, 2], [0], [0]>} : vector<2x8x8xf32>, vector<2x8x8xf32>, vector<2x8x8xf32> -> vector<2x8x8xf32>
    "tpu.trace_stop"() : () -> ()
    %68 = tpu.reciprocal %65 {approx = true} : vector<2x8x1xf32> -> vector<2x8x1xf32>
    %69 = vector.broadcast %68 : vector<2x8x1xf32> to vector<2x8x8xf32>
    %70 = arith.mulf %67, %69 : vector<2x8x8xf32>
    %71 = vector.shape_cast %70 : vector<2x8x8xf32> to vector<16x8xf32>
    %c0_24 = arith.constant 0 : index
    %c8 = arith.constant 8 : index
    %72 = vector.load %arg13[%c0_24, %c8] : memref<16x32xf32, #tpu.memory_space<vmem>>, vector<16x8xf32>
    tpu.vector_store %arg13[%c0_24, %c8], %71 {strides = array<i32>} : memref<16x32xf32, #tpu.memory_space<vmem>>, vector<16x8xf32>,
    %73 = vector.extract_strided_slice %28 {offsets = [0, 0, 16], sizes = [2, 8, 8], strides = [1, 1, 1]} : vector<2x8x32xf32> to vector<2x8x8xf32>
    %74 = vector.extract_strided_slice %30 {offsets = [0, 0, 16], sizes = [2, 8, 8], strides = [1, 1, 1]} : vector<2x8x32xf32> to vector<2x8x8xf32>
    "tpu.trace_start"() <{level = 10 : i32, message = "bqd,bkd->bqk"}> : () -> ()
    %cst_25 = arith.constant dense<0.000000e+00> : vector<2x8x8xf32>
    %75 = tpu.matmul %73, %74, %cst_25 {dimension_numbers = #tpu.dot_dimension_numbers<[2], [2], [1], [1], [0, 0, 0, 1, 1, 1], [0], [0]>} : vector<2x8x8xf32>, vector<2x8x8xf32>, vector<2x8x8xf32> -> vector<2x8x8xf32>
    "tpu.trace_stop"() : () -> ()
    %76 = vector.broadcast %34 : vector<1x8x8xf32> to vector<2x8x8xf32>
    %77 = arith.addf %75, %76 : vector<2x8x8xf32>
    %cst_26 = arith.constant dense<0xFF800000> : vector<2x8xf32>
    %78 = vector.multi_reduction <maximumf>, %77, %cst_26 [2] : vector<2x8x8xf32> to vector<2x8xf32>
    %79 = vector.shape_cast %78 : vector<2x8xf32> to vector<2x8x1xf32>
    %80 = vector.broadcast %79 : vector<2x8x1xf32> to vector<2x8x8xf32>
    %81 = arith.subf %77, %80 : vector<2x8x8xf32>
    %82 = math.exp %81 : vector<2x8x8xf32>
    %cst_27 = arith.constant dense<0.000000e+00> : vector<2x8xf32>
    %83 = vector.multi_reduction <add>, %82, %cst_27 [2] : vector<2x8x8xf32> to vector<2x8xf32>
    %84 = vector.shape_cast %83 : vector<2x8xf32> to vector<2x8x1xf32>
    %85 = vector.extract_strided_slice %32 {offsets = [0, 0, 16], sizes = [2, 8, 8], strides = [1, 1, 1]} : vector<2x8x32xf32> to vector<2x8x8xf32>
    "tpu.trace_start"() <{level = 10 : i32, message = "bqk,bkd->bqd"}> : () -> ()
    %cst_28 = arith.constant dense<0.000000e+00> : vector<2x8x8xf32>
    %86 = tpu.matmul %82, %85, %cst_28 {dimension_numbers = #tpu.dot_dimension_numbers<[2], [1], [1], [2], [0, 0, 0, 1, 1, 2], [0], [0]>} : vector<2x8x8xf32>, vector<2x8x8xf32>, vector<2x8x8xf32> -> vector<2x8x8xf32>
    "tpu.trace_stop"() : () -> ()
    %87 = tpu.reciprocal %84 {approx = true} : vector<2x8x1xf32> -> vector<2x8x1xf32>
    %88 = vector.broadcast %87 : vector<2x8x1xf32> to vector<2x8x8xf32>
    %89 = arith.mulf %86, %88 : vector<2x8x8xf32>
    %90 = vector.shape_cast %89 : vector<2x8x8xf32> to vector<16x8xf32>
    %c0_29 = arith.constant 0 : index
    %c16 = arith.constant 16 : index
    %91 = vector.load %arg13[%c0_29, %c16] : memref<16x32xf32, #tpu.memory_space<vmem>>, vector<16x8xf32>
    tpu.vector_store %arg13[%c0_29, %c16], %90 {strides = array<i32>} : memref<16x32xf32, #tpu.memory_space<vmem>>, vector<16x8xf32>,
    %92 = vector.extract_strided_slice %28 {offsets = [0, 0, 24], sizes = [2, 8, 8], strides = [1, 1, 1]} : vector<2x8x32xf32> to vector<2x8x8xf32>
    %93 = vector.extract_strided_slice %30 {offsets = [0, 0, 24], sizes = [2, 8, 8], strides = [1, 1, 1]} : vector<2x8x32xf32> to vector<2x8x8xf32>
    "tpu.trace_start"() <{level = 10 : i32, message = "bqd,bkd->bqk"}> : () -> ()
    %cst_30 = arith.constant dense<0.000000e+00> : vector<2x8x8xf32>
    %94 = tpu.matmul %92, %93, %cst_30 {dimension_numbers = #tpu.dot_dimension_numbers<[2], [2], [1], [1], [0, 0, 0, 1, 1, 1], [0], [0]>} : vector<2x8x8xf32>, vector<2x8x8xf32>, vector<2x8x8xf32> -> vector<2x8x8xf32>
    "tpu.trace_stop"() : () -> ()
    %95 = vector.broadcast %34 : vector<1x8x8xf32> to vector<2x8x8xf32>
    %96 = arith.addf %94, %95 : vector<2x8x8xf32>
    %cst_31 = arith.constant dense<0xFF800000> : vector<2x8xf32>
    %97 = vector.multi_reduction <maximumf>, %96, %cst_31 [2] : vector<2x8x8xf32> to vector<2x8xf32>
    %98 = vector.shape_cast %97 : vector<2x8xf32> to vector<2x8x1xf32>
    %99 = vector.broadcast %98 : vector<2x8x1xf32> to vector<2x8x8xf32>
    %100 = arith.subf %96, %99 : vector<2x8x8xf32>
    %101 = math.exp %100 : vector<2x8x8xf32>
    %cst_32 = arith.constant dense<0.000000e+00> : vector<2x8xf32>
    %102 = vector.multi_reduction <add>, %101, %cst_32 [2] : vector<2x8x8xf32> to vector<2x8xf32>
    %103 = vector.shape_cast %102 : vector<2x8xf32> to vector<2x8x1xf32>
    %104 = vector.extract_strided_slice %32 {offsets = [0, 0, 24], sizes = [2, 8, 8], strides = [1, 1, 1]} : vector<2x8x32xf32> to vector<2x8x8xf32>
    "tpu.trace_start"() <{level = 10 : i32, message = "bqk,bkd->bqd"}> : () -> ()
    %cst_33 = arith.constant dense<0.000000e+00> : vector<2x8x8xf32>
    %105 = tpu.matmul %101, %104, %cst_33 {dimension_numbers = #tpu.dot_dimension_numbers<[2], [1], [1], [2], [0, 0, 0, 1, 1, 2], [0], [0]>} : vector<2x8x8xf32>, vector<2x8x8xf32>, vector<2x8x8xf32> -> vector<2x8x8xf32>
    "tpu.trace_stop"() : () -> ()
    %106 = tpu.reciprocal %103 {approx = true} : vector<2x8x1xf32> -> vector<2x8x1xf32>
    %107 = vector.broadcast %106 : vector<2x8x1xf32> to vector<2x8x8xf32>
    %108 = arith.mulf %105, %107 : vector<2x8x8xf32>
    %109 = vector.shape_cast %108 : vector<2x8x8xf32> to vector<16x8xf32>
    %c0_34 = arith.constant 0 : index
    %c24 = arith.constant 24 : index
    %110 = vector.load %arg13[%c0_34, %c24] : memref<16x32xf32, #tpu.memory_space<vmem>>, vector<16x8xf32>
    tpu.vector_store %arg13[%c0_34, %c24], %109 {strides = array<i32>} : memref<16x32xf32, #tpu.memory_space<vmem>>, vector<16x8xf32>,
    %c0_35 = arith.constant 0 : index
    %c0_36 = arith.constant 0 : index
    %111 = vector.load %arg13[%c0_35, %c0_36] : memref<16x32xf32, #tpu.memory_space<vmem>>, vector<16x32xf32>
    %112 = arith.addf %111, %0 : vector<16x32xf32>
    %c0_37 = arith.constant 0 : index
    %c0_38 = arith.constant 0 : index
    %113 = vector.load %arg6[%c0_37, %c0_38] : memref<1x32xf32, #tpu.memory_space<vmem>>, vector<1x32xf32>
    %c0_39 = arith.constant 0 : index
    %c0_40 = arith.constant 0 : index
    %114 = vector.load %arg7[%c0_39, %c0_40] : memref<1x32xf32, #tpu.memory_space<vmem>>, vector<1x32xf32>
    %cst_41 = arith.constant dense<0.000000e+00> : vector<16xf32>
    %115 = vector.multi_reduction <add>, %112, %cst_41 [1] : vector<16x32xf32> to vector<16xf32>
    %116 = vector.shape_cast %115 : vector<16xf32> to vector<16x1xf32>
    %cst_42 = arith.constant 3.200000e+01 : f32
    %117 = vector.broadcast %cst_42 : f32 to vector<16x1xf32>
    %118 = arith.divf %116, %117 : vector<16x1xf32>
    %119 = vector.broadcast %118 : vector<16x1xf32> to vector<16x32xf32>
    %120 = arith.subf %112, %119 : vector<16x32xf32>
    %121 = arith.mulf %120, %120 : vector<16x32xf32>
    %cst_43 = arith.constant dense<0.000000e+00> : vector<16xf32>
    %122 = vector.multi_reduction <add>, %121, %cst_43 [1] : vector<16x32xf32> to vector<16xf32>
    %123 = vector.shape_cast %122 : vector<16xf32> to vector<16x1xf32>
    %cst_44 = arith.constant 3.200000e+01 : f32
    %124 = vector.broadcast %cst_44 : f32 to vector<16x1xf32>
    %125 = arith.divf %123, %124 : vector<16x1xf32>
    %126 = vector.broadcast %118 : vector<16x1xf32> to vector<16x32xf32>
    %127 = arith.subf %112, %126 : vector<16x32xf32>
    %cst_45 = arith.constant 9.99999974E-6 : f32
    %128 = vector.broadcast %cst_45 : f32 to vector<16x1xf32>
    %129 = arith.addf %125, %128 : vector<16x1xf32>
    %130 = math.rsqrt %129 : vector<16x1xf32>
    %131 = vector.broadcast %130 : vector<16x1xf32> to vector<16x32xf32>
    %132 = arith.mulf %127, %131 : vector<16x32xf32>
    %133 = vector.broadcast %113 : vector<1x32xf32> to vector<16x32xf32>
    %134 = arith.mulf %132, %133 : vector<16x32xf32>
    %135 = vector.broadcast %114 : vector<1x32xf32> to vector<16x32xf32>
    %136 = arith.addf %134, %135 : vector<16x32xf32>
    %c0_46 = arith.constant 0 : index
    %c0_47 = arith.constant 0 : index
    %137 = vector.load %arg8[%c0_46, %c0_47] : memref<32x32xf32, #tpu.memory_space<vmem>>, vector<32x32xf32>
    %cst_48 = arith.constant dense<0.000000e+00> : vector<16x32xf32>
    %138 = tpu.matmul %136, %137, %cst_48 {dimension_numbers = #tpu.dot_dimension_numbers<[1], [0], [0], [1], [0, 0, 1, 1], [], []>} : vector<16x32xf32>, vector<32x32xf32>, vector<16x32xf32> -> vector<16x32xf32>
    %c0_49 = arith.constant 0 : index
    %c0_50 = arith.constant 0 : index
    %139 = vector.load %arg9[%c0_49, %c0_50] : memref<1x32xf32, #tpu.memory_space<vmem>>, vector<1x32xf32>
    %140 = vector.broadcast %139 : vector<1x32xf32> to vector<16x32xf32>
    %141 = arith.addf %138, %140 : vector<16x32xf32>
    %cst_51 = arith.constant 0.000000e+00 : f32
    %142 = vector.broadcast %cst_51 : f32 to vector<16x32xf32>
    %143 = arith.maximumf %141, %142 : vector<16x32xf32>
    %c0_52 = arith.constant 0 : index
    %c0_53 = arith.constant 0 : index
    %144 = vector.load %arg10[%c0_52, %c0_53] : memref<32x32xf32, #tpu.memory_space<vmem>>, vector<32x32xf32>
    %cst_54 = arith.constant dense<0.000000e+00> : vector<16x32xf32>
    %145 = tpu.matmul %143, %144, %cst_54 {dimension_numbers = #tpu.dot_dimension_numbers<[1], [0], [0], [1], [0, 0, 1, 1], [], []>} : vector<16x32xf32>, vector<32x32xf32>, vector<16x32xf32> -> vector<16x32xf32>
    %c0_55 = arith.constant 0 : index
    %c0_56 = arith.constant 0 : index
    %146 = vector.load %arg11[%c0_55, %c0_56] : memref<1x32xf32, #tpu.memory_space<vmem>>, vector<1x32xf32>
    %147 = vector.broadcast %146 : vector<1x32xf32> to vector<16x32xf32>
    %148 = arith.addf %145, %147 : vector<16x32xf32>
    %cst_57 = arith.constant 0.000000e+00 : f32
    %149 = vector.broadcast %cst_57 : f32 to vector<16x32xf32>
    %150 = arith.maximumf %148, %149 : vector<16x32xf32>
    %151 = arith.addf %150, %112 : vector<16x32xf32>
    %c0_58 = arith.constant 0 : index
    %c0_59 = arith.constant 0 : index
    %152 = vector.load %arg12[%c0_58, %c0_59] : memref<16x32xf32, #tpu.memory_space<vmem>>, vector<16x32xf32>
    tpu.vector_store %arg12[%c0_58, %c0_59], %151 {strides = array<i32>} : memref<16x32xf32, #tpu.memory_space<vmem>>, vector<16x32xf32>,
    return
  }
  func.func @transform_0(%arg0: i32) -> (i32, i32) {
    %c0_i32 = arith.constant 0 : i32
    %c0_i32_0 = arith.constant 0 : i32
    return %arg0, %c0_i32 : i32, i32
  }
  func.func @transform_1(%arg0: i32) -> (i32, i32) {
    %c0_i32 = arith.constant 0 : i32
    %c0_i32_0 = arith.constant 0 : i32
    %c0_i32_1 = arith.constant 0 : i32
    return %c0_i32, %c0_i32_0 : i32, i32
  }
  func.func @transform_2(%arg0: i32) -> (i32, i32) {
    %c0_i32 = arith.constant 0 : i32
    %c0_i32_0 = arith.constant 0 : i32
    %c0_i32_1 = arith.constant 0 : i32
    return %c0_i32, %c0_i32_0 : i32, i32
  }
  func.func @transform_3(%arg0: i32) -> (i32, i32) {
    %c0_i32 = arith.constant 0 : i32
    %c0_i32_0 = arith.constant 0 : i32
    %c0_i32_1 = arith.constant 0 : i32
    return %c0_i32, %c0_i32_0 : i32, i32
  }
  func.func @transform_4(%arg0: i32) -> (i32, i32) {
    %c0_i32 = arith.constant 0 : i32
    %c0_i32_0 = arith.constant 0 : i32
    %c0_i32_1 = arith.constant 0 : i32
    return %c0_i32, %c0_i32_0 : i32, i32
  }
  func.func @transform_5(%arg0: i32) -> (i32, i32) {
    %c0_i32 = arith.constant 0 : i32
    %c0_i32_0 = arith.constant 0 : i32
    %c0_i32_1 = arith.constant 0 : i32
    return %c0_i32, %c0_i32_0 : i32, i32
  }
  func.func @transform_6(%arg0: i32) -> (i32, i32) {
    %c0_i32 = arith.constant 0 : i32
    %c0_i32_0 = arith.constant 0 : i32
    %c0_i32_1 = arith.constant 0 : i32
    return %c0_i32, %c0_i32_0 : i32, i32
  }
  func.func @transform_7(%arg0: i32) -> (i32, i32) {
    %c0_i32 = arith.constant 0 : i32
    %c0_i32_0 = arith.constant 0 : i32
    %c0_i32_1 = arith.constant 0 : i32
    return %c0_i32, %c0_i32_0 : i32, i32
  }
  func.func @transform_8(%arg0: i32) -> (i32, i32) {
    %c0_i32 = arith.constant 0 : i32
    %c0_i32_0 = arith.constant 0 : i32
    %c0_i32_1 = arith.constant 0 : i32
    return %c0_i32, %c0_i32_0 : i32, i32
  }
  func.func @transform_9(%arg0: i32) -> (i32, i32) {
    %c0_i32 = arith.constant 0 : i32
    %c0_i32_0 = arith.constant 0 : i32
    %c0_i32_1 = arith.constant 0 : i32
    return %c0_i32, %c0_i32_0 : i32, i32
  }
  func.func @transform_10(%arg0: i32) -> (i32, i32) {
    %c0_i32 = arith.constant 0 : i32
    %c0_i32_0 = arith.constant 0 : i32
    %c0_i32_1 = arith.constant 0 : i32
    return %c0_i32, %c0_i32_0 : i32, i32
  }
  func.func @transform_11(%arg0: i32) -> (i32, i32) {
    %c0_i32 = arith.constant 0 : i32
    %c0_i32_0 = arith.constant 0 : i32
    return %arg0, %c0_i32 : i32, i32
  }
}

</mosaic_0001>

<bundles_post_ra>
// kernel: tpu_custom_call.1
= control target key start
LH: loop header
LB: loop body
LE: loop exit
PB: predicated region body
PF: predicated region fallthrough
CT: control target
= control target key end

     0   :  { %16 = vsyncpa [#allocation4], 0  ;;  %s1474_s0 = inlined_call_operand.hbm [shape: f32[16,32], index: 0, kind: input, shape index: {}]   ;;  %s1475_s1 = inlined_call_operand.hbm [shape: f32[8,8], index: 1, kind: input, shape index: {}]   ;;  %s1476_s2 = inlined_call_operand.vmem [shape: f32[1,32], index: 2, kind: input, shape index: {}]   ;;  %s1477_s3 = inlined_call_operand.vmem [shape: f32[1,32], index: 3, kind: input, shape index: {}]   ;;  %s1478_s4 = inlined_call_operand.hbm [shape: f32[32,96], index: 4, kind: input, shape index: {}]   ;;  %s1479_s5 = inlined_call_operand.vmem [shape: f32[1,32], index: 5, kind: input, shape index: {}]   ;;  %s1480_s6 = inlined_call_operand.vmem [shape: f32[1,32], index: 6, kind: input, shape index: {}]   ;;  %s1481_s7 = inlined_call_operand.hbm [shape: f32[32,32], index: 7, kind: input, shape index: {}]   ;;  %s1482_s8 = inlined_call_operand.vmem [shape: f32[1,32], index: 8, kind: input, shape index: {}]   ;;  %s1483_s9 = inlined_call_operand.hbm [shape: f32[32,32], index: 9, kind: input, shape index: {}]   ;;  %s1484_s10 = inlined_call_operand.vmem [shape: f32[1,32], index: 10, kind: input, shape index: {}]   ;;  %s1485_s11 = inlined_call_operand.hbm [shape: f32[16,32], index: 11, kind: output, shape index: {}]  }
   0x1   :  { %17 = vsyncpa [#allocation7], 0 }
   0x2   :  { %18 = vsyncpa [#allocation10], 0  ;;  %s38_s19 = sshll.u32 %s1475_s1, 4  ;;  %s39_s19 = int_to_ptr.hbm [resolvable:$true] %s38_s19 }
   0x3   :  { %19 = vsyncpa [#allocation5], 0  ;;  %s1189_s20 = smov [#allocation6]   ;;  %s69_s24 = sshll.u32 %s1481_s7, 4  ;;  %s70_s24 = int_to_ptr.hbm [resolvable:$true] %s69_s24 }
   0x4   :  { %s40_s21 = sshll.u32 %s1189_s20, 4  ;;  %s1190_s25 = smov [#allocation9]   ;;  %s41_s21 = int_to_ptr.vmem [resolvable:$true] %s40_s21 }
   0x5   :  { %43 = dma.hbm_to_vmem [thread:$0]  %s39_s19, 128, %s41_s21, [#allocation7]  }
   0x6   :  { %s71_s26 = sshll.u32 %s1190_s25, 4  ;;  %s24_s29 = sshll.u32 %s1474_s0, 4  ;;  %s72_s26 = int_to_ptr.vmem [resolvable:$true] %s71_s26  ;;  %s25_s29 = int_to_ptr.hbm [resolvable:$true] %s24_s29 }
   0x7   :  { %s1191_s1 = smov 128   ;;  %s1192_s30 = smov 8  }
   0x8   :  { %77 = dma.hbm_to_vmem [thread:$0]  %s70_s24, 512, %s72_s26, [#allocation10], %s1191_s1, %s1191_s1, %s1192_s30  }
   0x9   :  { %s52_s14 = sshll.u32 %s1478_s4, 4  ;;  %s1193_s7 = smov [#allocation3]   ;;  %s53_s14 = int_to_ptr.hbm [resolvable:$true] %s52_s14 }
   0xa   :  { %s26_s15 = sshll.u32 %s1193_s7, 4  ;;  %s1194_s0 = smov [#allocation8]   ;;  %s27_s15 = int_to_ptr.vmem [resolvable:$true] %s26_s15 }
   0xb   :  { %32 = dma.hbm_to_vmem [thread:$0]  %s25_s29, 256, %s27_s15, [#allocation4], %s1191_s1, %s1191_s1, %s1192_s30  }
   0xc   :  { %s54_s16 = sshll.u32 %s1194_s0, 4  ;;  %s84_s19 = sshll.u32 %s1483_s9, 4  ;;  %s55_s16 = int_to_ptr.vmem [resolvable:$true] %s54_s16  ;;  %s85_s19 = int_to_ptr.hbm [resolvable:$true] %s84_s19 }
   0xd   :  { %60 = dma.hbm_to_vmem [thread:$0]  %s53_s14, 512, %s55_s16, [#allocation7], %s1191_s1, %s1191_s1, %s1192_s30  }
   0xe   :  { %s1195_s4 = smov [#allocation11]  }
   0xf   :  { %s86_s20 = sshll.u32 %s1195_s4, 4  ;;  %s87_s20 = int_to_ptr.vmem [resolvable:$true] %s86_s20 }
  0x10   :  { %92 = dma.hbm_to_vmem [thread:$0]  %s85_s19, 512, %s87_s20, [#allocation10], %s1191_s1, %s1191_s1, %s1192_s30  }
  0x11   :  { %1181 = dma.done.wait [#allocation4], 256  }
  0x12   :  { %1182 = vsyncadd [#allocation4], 4294967040 }
  0x13   :  { %1183 = dma.done.wait [#allocation7], 640  }
  0x14   :  { %1184 = vsyncadd [#allocation7], 4294966656 }
  0x15   :  { %1185 = dma.done.wait [#allocation10], 1024  }
  0x16   :  { %1186 = vsyncadd [#allocation10], 4294966272  ;;  %vm119_vm0 = vcmask 261120   ;;  %v1298_v0 = vld [vmem:[#allocation3] sm:$0xff]  ;;  %v1302_v2 = vld [vmem:[#allocation3 + $0x8] sm:$0xff]  ;;  %v1196_v4 = vmov 32.0  }
  0x17   :  { %v120_v1 = vsel %vm119_vm0, %v1298_v0, 0.0  ;;  %v123_v3 = vsel %vm119_vm0, %v1302_v2, 0.0  ;;  %995 = vrcp.f32 %v1196_v4  ;;  %v184_v21 = vld [vmem:[#allocation8 + $0x18] sm:$0xff]  ;;  %v183_v22 = vld [vmem:[#allocation8 + $0x10] sm:$0xff]  ;;  %v182_v23 = vld [vmem:[#allocation8 + $0x8] sm:$0xff]  ;;  %s1199_s24 = smov 120  }
  0x18   :  { %121 = vadd.xlane.f32.xlu0 %v120_v1  ;;  %203 = vmatpush.msra.mxu0 %v184_v21  ;;  %v181_v24 = vld [vmem:[#allocation8] sm:$0xff]  ;;  %v989_v39 = vld [vmem:[%s1476_s2] ss:$0 sm:$0xff]  ;;  %s1197_s2 = smov 88   ;;  %s1200_s25 = smov 80   ;;  %vm218_vm8 = vcmask 64512  }
  0x19   :  { %v990_v43 = vld [vmem:[%s1477_s3] ss:$0 sm:$0xff]  ;;  %s1198_s3 = smov 96   ;;  %s1201_s26 = smov 112   ;;  %vm484_vm9 = vcmask 130112   ;;  %vm625_vm10 = vcmask 195712  }
  0x1a   :  { %204 = vmatpush.msra.mxu0 %v183_v22  ;;  %s1202_s27 = smov 64   ;;  %s1203_s28 = smov 56   ;;  %vm766_vm11 = vcmask 261312  }
  0x1b   :  { %s1204_s29 = smov 104   ;;  %s1205_s12 = smov 72  }
  0x1c   :  { %205 = vmatpush.msra.mxu0 %v182_v23  ;;  %s1206_s13 = smov 40   ;;  %s1207_s14 = smov 48  }
  0x1d   :  { %v996_v5 = vpop.eup %995  ;;  %s1208_s7 = smov 16   ;;  %s1209_s15 = smov 24  }
  0x1e   :  { %v127_v6 = vmul.f32 32.0, %v996_v5  ;;  %vm131_vm1 = vweird.f32 %v996_v5  ;;  %206 = vmatpush.msra.mxu0 %v181_v24  ;;  %s917_s22 = sshll.u32 %s1485_s11, 4  ;;  %s918_s22 = int_to_ptr.hbm [resolvable:$true] %s917_s22 }
  0x20   :  { %124 = vadd.xlane.f32.xlu0 %v123_v3  ;;  %v128_v7 = vsub.f32 1.0, %v127_v6 }
  0x22   :  { %v129_v8 = vmul.f32 %v996_v5, %v128_v7 }
  0x24   :  { %v130_v9 = vadd.f32 %v996_v5, %v129_v8 }
  0x26   :  { %v1306_v10 = vsel %vm131_vm1, %v996_v5, %v130_v9  ;;  %v1359_v9 = vld [vmem:[#allocation6] sm:$0xff] }
  0x8b   :  { %v122_v11 = vpop.xlane.xlu0 %121 }
  0x8c   :  { %v133_v12 = vmul.f32 %v1306_v10, %v122_v11 }
  0x8e   :  { %v135_v13 = vsub.f32 %v1298_v0, %v133_v12 }
  0x90   :  { %v137_v14 = vmul.f32 %v135_v13, %v135_v13 }
  0x92   :  { %v139_v15 = vsel %vm119_vm0, %v137_v14, 0.0 }
  0x93   :  { %140 = vadd.xlane.f32.xlu1 %v139_v15  ;;  %v125_v16 = vpop.xlane.xlu0 %124 }
  0x94   :  { %v134_v17 = vmul.f32 %v1306_v10, %v125_v16 }
  0x96   :  { %v136_v18 = vsub.f32 %v1302_v2, %v134_v17 }
  0x98   :  { %v138_v19 = vmul.f32 %v136_v18, %v136_v18 }
  0x9a   :  { %v142_v20 = vsel %vm119_vm0, %v138_v19, 0.0 }
  0x9b   :  { %143 = vadd.xlane.f32.xlu1 %v142_v20 }
 0x106   :  { %v141_v25 = vpop.xlane.xlu1 %140 }
 0x107   :  { %v145_v26 = vmul.f32 %v141_v25, %v1306_v10 }
 0x109   :  { %v147_v27 = vadd.f32 1e-05, %v145_v26 }
 0x10b   :  { %997 = vrsqrt.f32 %v147_v27  ;;  %vm155_vm3 = vweird.f32 %v147_v27 }
 0x10e   :  { %v144_v28 = vpop.xlane.xlu1 %143 }
 0x10f   :  { %v146_v29 = vmul.f32 %v144_v28, %v1306_v10 }
 0x111   :  { %v998_v30 = vpop.eup %997  ;;  %v148_v31 = vadd.f32 1e-05, %v146_v29 }
 0x112   :  { %v150_v32 = vmul.f32 %v998_v30, %v147_v27  ;;  %vm156_vm2 = vweird.f32 %v998_v30 }
 0x113   :  { %999 = vrsqrt.f32 %v148_v31  ;;  %vm157_vm4 = vmor %vm155_vm3, %vm156_vm2  ;;  %vm165_vm6 = vweird.f32 %v148_v31 }
 0x114   :  { %v151_v33 = vmul.f32 %v998_v30, %v150_v32 }
 0x116   :  { %v152_v34 = vmul.f32 0.5, %v151_v33 }
 0x118   :  { %v153_v35 = vsub.f32 1.5, %v152_v34 }
 0x119   :  { %v1000_v36 = vpop.eup %999 }
 0x11a   :  { %v154_v37 = vmul.f32 %v998_v30, %v153_v35  ;;  %v160_v38 = vmul.f32 %v1000_v36, %v148_v31  ;;  %vm166_vm5 = vweird.f32 %v1000_v36 }
 0x11b   :  { %vm167_vm7 = vmor %vm165_vm6, %vm166_vm5 }
 0x11c   :  { %v158_v40 = vsel %vm157_vm4, %v998_v30, %v154_v37  ;;  %v161_v41 = vmul.f32 %v1000_v36, %v160_v38 }
 0x11d   :  { %v169_v42 = vmul.f32 %v158_v40, %v135_v13 }
 0x11e   :  { %v162_v44 = vmul.f32 0.5, %v161_v41 }
 0x11f   :  { %v174_v45 = vmul.f32 %v989_v39, %v169_v42 }
 0x120   :  { %v163_v46 = vsub.f32 1.5, %v162_v44 }
 0x121   :  { %v179_v47 = vadd.f32 %v990_v43, %v174_v45 }
 0x122   :  { %v164_v48 = vmul.f32 %v1000_v36, %v163_v46 }
 0x123   :  { %932 = vmatmul.msk.f32.vlgmr.msra.gmra.mxu0 %vm119_vm0, %v179_v47 }
 0x124   :  { %v168_v49 = vsel %vm167_vm7, %v1000_v36, %v164_v48 }
 0x125   :  { %v170_v50 = vmul.f32 %v168_v49, %v136_v18 }
 0x127   :  { %v175_v51 = vmul.f32 %v989_v39, %v170_v50 }
 0x129   :  { %v180_v52 = vadd.f32 %v990_v43, %v175_v51 }
 0x12b   :  { %933 = vmatmul.msk.f32.gmra.mxu0 %vm119_vm0, %v180_v52 }
 0x1a0   :  { %v1324_v53 = vpop.f32.mrf.mxu0 }
 0x1a1   :  { %348 = vrot.lane.b32.xlu0 %v1324_v53, %s1197_s2  ;;  %216 = vrot.lane.b32.xlu2 %v1324_v53, %s1198_s3 }
 0x1a2   :  { %346 = vrot.lane.b32.xlu1 %v1324_v53, %s1199_s24 }
 0x1a8   :  { %v1329_v54 = vpop.f32.mrf.mxu0 }
 0x1a9   :  { %244 = vrot.lane.b32.xlu2 %v1329_v54, %s1198_s3  ;;  %v984_v55 = vpack.i.bf16 %v1329_v54, %v1324_v53 }
 0x1aa   :  { %489 = vrot.lane.b32.xlu1 %v1324_v53, %s1200_s25 }
 0x1b1   :  { %487 = vrot.lane.b32.xlu2 %v1324_v53, %s1201_s26 }
 0x1b2   :  { %985 = vrot.lane.b32.xlu1 %v984_v55, %s1202_s27 }
 0x1ba   :  { %376 = vrot.lane.b32.xlu1 %v1329_v54, %s1197_s2 }
 0x1c2   :  { %374 = vrot.lane.b32.xlu1 %v1329_v54, %s1199_s24 }
 0x1ca   :  { %420 = vrot.lane.b32.xlu1 %v1324_v53, %s1203_s28 }
 0x1d2   :  { %628 = vrot.lane.b32.xlu1 %v1324_v53, %s1204_s29 }
 0x1da   :  { %517 = vrot.lane.b32.xlu1 %v1329_v54, %s1200_s25 }
 0x1e2   :  { %658 = vrot.lane.b32.xlu1 %v1329_v54, %s1205_s12 }
 0x1fb   :  { %v217_v56 = vpop.permute.xlu2 %216 }
 0x1fc   :  { %934 = vmatpush.xpose.msk.msra.mxu1 %vm218_vm8, %v217_v56 }
 0x1ff   :  { %935 = vmatmul.msk.f32.vlgmr.msra.gmra.mxu1 %vm218_vm8, %v1324_v53 }
 0x203   :  { %v245_v57 = vpop.permute.xlu2 %244 }
 0x204   :  { %936 = vmatpush.xpose.msk.msra.mxu2 %vm218_vm8, %v245_v57 }
 0x207   :  { %937 = vmatmul.msk.f32.vlgmr.msra.gmra.mxu2 %vm218_vm8, %v1329_v54 }
 0x20b   :  { %v488_v4 = vpop.permute.xlu2 %487 }
 0x213   :  { %v349_v58 = vpop.permute.xlu0 %348 }
 0x214   :  { %v347_v59 = vpop.permute.xlu1 %346  ;;  %940 = vmatpush.xpose.msk.msrb.mxu1 %vm218_vm8, %v349_v58 }
 0x217   :  { %941 = vmatmul.msk.f32.vlgmr.msrb.gmra.mxu1 %vm218_vm8, %v347_v59 }
 0x21c   :  { %v490_v60 = vpop.permute.xlu1 %489 }
 0x224   :  { %v986_v61 = vpop.permute.xlu1 %985 }
 0x225   :  { %v987_v62 = vunpack.i.l.bf16 %v986_v61  ;;  %v988_v63 = vunpack.i.h.bf16 %v986_v61 }
 0x227   :  { %309 = vmatpush.msra.mxu3 %v987_v62 }
 0x229   :  { %335 = vmatpush.msrb.mxu3 %v988_v63 }
 0x22c   :  { %v377_v1 = vpop.permute.xlu1 %376 }
 0x22d   :  { %942 = vmatpush.xpose.msk.msrb.mxu2 %vm218_vm8, %v377_v1 }
 0x231   :  { %946 = vmatpush.xpose.msk.msra.mxu2 %vm218_vm8, %v490_v60 }
 0x234   :  { %v375_v3 = vpop.permute.xlu1 %374 }
 0x235   :  { %943 = vmatmul.msk.f32.vlgmr.msrb.gmra.mxu2 %vm218_vm8, %v375_v3 }
 0x23c   :  { %v421_v5 = vpop.permute.xlu1 %420 }
 0x23d   :  { %947 = vmatmul.msk.f32.vlgmr.msra.gmra.mxu2 %vm218_vm8, %v488_v4 }
 0x244   :  { %v629_v6 = vpop.permute.xlu1 %628 }
 0x24c   :  { %v518_v7 = vpop.permute.xlu1 %517 }
 0x254   :  { %v659_v8 = vpop.permute.xlu1 %658 }
 0x255   :  { %954 = vmatpush.xpose.msk.msrb.mxu0 %vm218_vm8, %v659_v8 }
 0x27c   :  { %v240_v11 = vpop.f32.mrf.mxu1 }
 0x27d   :  { %v241_v12 = vadd.f32 %v240_v11, %v1359_v9 }
 0x27f   :  { %v270_v13 = vsel %vm218_vm8, %v241_v12, -inf }
 0x280   :  { %271 = vmax.xlane.f32.xlu2 %v270_v13 }
 0x28a   :  { %v267_v14 = vpop.f32.mrf.mxu2 }
 0x28b   :  { %v268_v15 = vadd.f32 %v267_v14, %v1359_v9 }
 0x28d   :  { %v273_v16 = vsel %vm218_vm8, %v268_v15, -inf }
 0x28e   :  { %274 = vmax.xlane.f32.xlu0 %v273_v16 }
 0x294   :  { %v371_v17 = vpop.f32.mrf.mxu1 }
 0x295   :  { %v372_v18 = vadd.f32 %v371_v17, %v1359_v9 }
 0x297   :  { %v402_v19 = vsel %vm218_vm8, %v372_v18, -inf }
 0x298   :  { %403 = vmax.xlane.f32.xlu2 %v402_v19 }
 0x2a2   :  { %630 = vrot.lane.b32.xlu0 %v1324_v53, %s1205_s12 }
 0x2b0   :  { %515 = vrot.lane.b32.xlu2 %v1329_v54, %s1201_s26 }
 0x2b8   :  { %v399_v20 = vpop.f32.mrf.mxu2  ;;  %656 = vrot.lane.b32.xlu2 %v1329_v54, %s1204_s29 }
 0x2b9   :  { %v400_v21 = vadd.f32 %v399_v20, %v1359_v9 }
 0x2bb   :  { %v405_v22 = vsel %vm218_vm8, %v400_v21, -inf }
 0x2bc   :  { %406 = vmax.xlane.f32.xlu1 %v405_v22 }
 0x2c0   :  { %702 = vrot.lane.b32.xlu2 %v1324_v53, %s1206_s13  ;;  %v512_v23 = vpop.f32.mrf.mxu2 }
 0x2c1   :  { %v513_v24 = vadd.f32 %v512_v23, %v1359_v9 }
 0x2c3   :  { %v543_v25 = vsel %vm218_vm8, %v513_v24, -inf }
 0x2cc   :  { %544 = vmax.xlane.f32.xlu0 %v543_v25 }
 0x2d5   :  { %446 = vrot.lane.b32.xlu1 %v1329_v54, %s1203_s28 }
 0x2dd   :  { %587 = vrot.lane.b32.xlu1 %v1329_v54, %s1207_s14 }
 0x2e0   :  { %561 = vrot.lane.b32.xlu0 %v1324_v53, %s1207_s14 }
 0x2f3   :  { %v272_v26 = vpop.xlane.xlu2 %271 }
 0x2f4   :  { %v276_v27 = vsub.f32 %v241_v12, %v272_v26 }
 0x2f6   :  { %v278_v28 = vmul.f32 1.442695, %v276_v27 }
 0x2f8   :  { %1001 = vpow2.f32 %v278_v28 }
 0x2fe   :  { %v1383_v29 = vpop.eup %1001 }
 0x2ff   :  { %938 = vmatmul.msk.f32.vlgmr.msra.gmra.mxu3 %vm218_vm8, %v1383_v29 }
 0x300   :  { %441 = vmatpush.msra.mxu3 %v421_v5 }
 0x301   :  { %v275_v30 = vpop.xlane.xlu0 %274 }
 0x302   :  { %v277_v31 = vsub.f32 %v268_v15, %v275_v30 }
 0x304   :  { %v280_v32 = vmul.f32 1.442695, %v277_v31 }
 0x306   :  { %1003 = vpow2.f32 %v280_v32 }
 0x30b   :  { %v404_v33 = vpop.xlane.xlu2 %403 }
 0x30c   :  { %v1004_v34 = vpop.eup %1003  ;;  %v408_v35 = vsub.f32 %v372_v18, %v404_v33 }
 0x30d   :  { %939 = vmatmul.msk.f32.vlgmr.msrb.gmra.mxu3 %vm218_vm8, %v1004_v34 }
 0x30e   :  { %v410_v36 = vmul.f32 1.442695, %v408_v35  ;;  %948 = vmatpush.xpose.msk.msrb.mxu3 %vm218_vm8, %v518_v7 }
 0x310   :  { %1005 = vpow2.f32 %v410_v36 }
 0x313   :  { %v516_v37 = vpop.permute.xlu2 %515 }
 0x314   :  { %v631_v38 = vpop.permute.xlu0 %630 }
 0x315   :  { %952 = vmatpush.xpose.msk.msrb.mxu2 %vm218_vm8, %v631_v38 }
 0x316   :  { %v1006_v39 = vpop.eup %1005 }
 0x317   :  { %944 = vmatmul.msk.f32.vlgmr.msra.gmra.mxu3 %vm218_vm8, %v1006_v39  ;;  %v414_v40 = vsel %vm218_vm8, %v1006_v39, 0.0 }
 0x318   :  { %415 = vadd.xlane.f32.xlu1 %v414_v40  ;;  %953 = vmatmul.msk.f32.vlgmr.msrb.gmra.mxu2 %vm218_vm8, %v629_v6  ;;  %v285_v6 = vsel %vm218_vm8, %v1004_v34, 0.0 }
 0x31b   :  { %v657_v41 = vpop.permute.xlu2 %656 }
 0x31c   :  { %955 = vmatmul.msk.f32.vlgmr.msrb.gmra.mxu0 %vm218_vm8, %v657_v41 }
 0x31f   :  { %949 = vmatmul.msk.f32.vlgmr.msrb.gmra.mxu3 %vm218_vm8, %v516_v37 }
 0x323   :  { %v703_v53 = vpop.permute.xlu2 %702 }
 0x32f   :  { %v407_v42 = vpop.xlane.xlu1 %406 }
 0x330   :  { %v409_v43 = vsub.f32 %v400_v21, %v407_v42 }
 0x332   :  { %v412_v44 = vmul.f32 1.442695, %v409_v43 }
 0x334   :  { %1007 = vpow2.f32 %v412_v44 }
 0x33a   :  { %v1008_v48 = vpop.eup %1007 }
 0x33b   :  { %v417_v22 = vsel %vm218_vm8, %v1008_v48, 0.0 }
 0x33f   :  { %v545_v45 = vpop.xlane.xlu0 %544 }
 0x340   :  { %v549_v46 = vsub.f32 %v513_v24, %v545_v45  ;;  %v282_v24 = vsel %vm218_vm8, %v1383_v29, 0.0 }
 0x342   :  { %v551_v49 = vmul.f32 1.442695, %v549_v46 }
 0x344   :  { %1009 = vpow2.f32 %v551_v49 }
 0x347   :  { %v447_v47 = vpop.permute.xlu1 %446 }
 0x348   :  { %467 = vmatpush.msra.mxu1 %v447_v47 }
 0x349   :  { %945 = vmatmul.msk.f32.vlgmr.msra.gmra.mxu1 %vm218_vm8, %v1008_v48 }
 0x34a   :  { %v1010_v52 = vpop.eup %1009 }
 0x34b   :  { %v555_v5 = vsel %vm218_vm8, %v1010_v52, 0.0 }
 0x34f   :  { %v588_v50 = vpop.permute.xlu1 %587 }
 0x350   :  { %608 = vmatpush.msrb.mxu1 %v588_v50 }
 0x352   :  { %v562_v51 = vpop.permute.xlu0 %561 }
 0x353   :  { %582 = vmatpush.msra.mxu3 %v562_v51 }
 0x354   :  { %950 = vmatmul.msk.f32.vlgmr.msra.gmra.mxu3 %vm218_vm8, %v1010_v52 }
 0x355   :  { %723 = vmatpush.msrb.mxu3 %v703_v53 }
 0x382   :  { %v1397_v55 = vpop.f32.mrf.mxu3 }
 0x38b   :  { %v416_v23 = vpop.xlane.xlu1 %415 }
 0x390   :  { %v1399_v56 = vpop.f32.mrf.mxu3 }
 0x399   :  { %v681_v57 = vpop.f32.mrf.mxu0 }
 0x39a   :  { %v682_v58 = vadd.f32 %v681_v57, %v1359_v9  ;;  %v443_v59 = vpop.f32.mrf.mxu3 }
 0x39b   :  { %v653_v60 = vpop.f32.mrf.mxu2 }
 0x39c   :  { %v654_v61 = vadd.f32 %v653_v60, %v1359_v9  ;;  %v687_v62 = vsel %vm218_vm8, %v682_v58, -inf }
 0x39d   :  { %688 = vmax.xlane.f32.xlu0 %v687_v62 }
 0x39e   :  { %v684_v63 = vsel %vm218_vm8, %v654_v61, -inf }
 0x39f   :  { %685 = vmax.xlane.f32.xlu2 %v684_v63 }
 0x3a2   :  { %v540_v1 = vpop.f32.mrf.mxu3 }
 0x3a3   :  { %v541_v3 = vadd.f32 %v540_v1, %v1359_v9 }
 0x3a5   :  { %v546_v4 = vsel %vm218_vm8, %v541_v3, -inf }
 0x3a7   :  { %547 = vmax.xlane.f32.xlu2 %v546_v4 }
 0x3bf   :  { %728 = vrot.lane.b32.xlu2 %v1329_v54, %s1206_s13 }
 0x3c6   :  { %v469_v37 = vpop.f32.mrf.mxu1 }
 0x3d7   :  { %v584_v31 = vpop.f32.mrf.mxu3 }
 0x3e8   :  { %556 = vadd.xlane.f32.xlu2 %v555_v5 }
 0x3f0   :  { %286 = vadd.xlane.f32.xlu2 %v285_v6 }
 0x410   :  { %v689_v7 = vpop.xlane.xlu0 %688 }
 0x411   :  { %v691_v8 = vsub.f32 %v682_v58, %v689_v7 }
 0x412   :  { %v686_v11 = vpop.xlane.xlu2 %685 }
 0x413   :  { %v694_v12 = vmul.f32 1.442695, %v691_v8  ;;  %v690_v13 = vsub.f32 %v654_v61, %v686_v11 }
 0x415   :  { %1011 = vpow2.f32 %v694_v12  ;;  %v692_v14 = vmul.f32 1.442695, %v690_v13 }
 0x417   :  { %1013 = vpow2.f32 %v692_v14 }
 0x41a   :  { %v548_v9 = vpop.xlane.xlu2 %547 }
 0x41b   :  { %v1012_v15 = vpop.eup %1011  ;;  %v550_v16 = vsub.f32 %v541_v3, %v548_v9  ;;  %v832_v9 = vld [vmem:[#allocation9 + $0x18] sm:$0xff] }
 0x41c   :  { %v699_v17 = vsel %vm218_vm8, %v1012_v15, 0.0  ;;  %855 = vmatpush.msra.mxu2 %v832_v9 }
 0x41d   :  { %v1014_v54 = vpop.eup %1013  ;;  %v553_v18 = vmul.f32 1.442695, %v550_v16  ;;  %700 = vadd.xlane.f32.xlu1 %v699_v17  ;;  %v830_v16 = vld [vmem:[#allocation9 + $0x8] sm:$0xff]  ;;  %v829_v17 = vld [vmem:[#allocation9] sm:$0xff] }
 0x41e   :  { %956 = vmatmul.msk.f32.vlgmr.msrb.gmra.mxu3 %vm218_vm8, %v1014_v54  ;;  %v696_v19 = vsel %vm218_vm8, %v1014_v54, 0.0 }
 0x41f   :  { %1015 = vpow2.f32 %v553_v18  ;;  %697 = vadd.xlane.f32.xlu0 %v696_v19 }
 0x420   :  { %1017 = vrcp.f32 %v416_v23 }
 0x422   :  { %v729_v20 = vpop.permute.xlu2 %728 }
 0x423   :  { %749 = vmatpush.msra.mxu1 %v729_v20 }
 0x425   :  { %v1016_v21 = vpop.eup %1015 }
 0x426   :  { %951 = vmatmul.msk.f32.vlgmr.msrb.gmra.mxu1 %vm218_vm8, %v1016_v21  ;;  %v1018_v25 = vpop.eup %1017  ;;  %v558_v27 = vsel %vm218_vm8, %v1016_v21, 0.0 }
 0x427   :  { %418 = vadd.xlane.f32.xlu0 %v417_v22  ;;  %v474_v26 = vmul.f32 %v1018_v25, %v443_v59 }
 0x42e   :  { %957 = vmatmul.msk.f32.vlgmr.msra.gmra.mxu1 %vm218_vm8, %v1012_v15  ;;  %v831_v15 = vld [vmem:[#allocation9 + $0x10] sm:$0xff] }
 0x42f   :  { %283 = vadd.xlane.f32.xlu0 %v282_v24  ;;  %856 = vmatpush.msra.mxu2 %v831_v15 }
 0x431   :  { %857 = vmatpush.msra.mxu2 %v830_v16 }
 0x433   :  { %858 = vmatpush.msra.mxu2 %v829_v17 }
 0x436   :  { %478 = vrot.lane.b32.xlu1 %v474_v26, %s1192_s30  ;;  %v991_v26 = vld [vmem:[%s1479_s5] ss:$0 sm:$0xff] }
 0x437   :  { %559 = vadd.xlane.f32.xlu0 %v558_v27 }
 0x45b   :  { %v557_v28 = vpop.xlane.xlu2 %556 }
 0x45c   :  { %1019 = vrcp.f32 %v557_v28 }
 0x462   :  { %v1020_v30 = vpop.eup %1019 }
 0x463   :  { %v287_v32 = vpop.xlane.xlu2 %286  ;;  %v615_v33 = vmul.f32 %v1020_v30, %v584_v31  ;;  %v992_v30 = vld [vmem:[%s1480_s6] ss:$0 sm:$0xff] }
 0x464   :  { %1021 = vrcp.f32 %v287_v32 }
 0x465   :  { %619 = vrot.lane.b32.xlu0 %v615_v33, %s1208_s7  ;;  %v871_v33 = vld [vmem:[#allocation11 + $0x18] sm:$0xff] }
 0x466   :  { %894 = vmatpush.msra.mxu0 %v871_v33 }
 0x46a   :  { %v1022_v34 = vpop.eup %1021 }
 0x46b   :  { %v343_v29 = vmul.f32 %v1022_v34, %v1399_v56 }
 0x46d   :  { %345 = vst.msk [vmem:[#allocation2 + $0x8] sm:$0xff] %vm218_vm8, %v343_v29 }
 0x490   :  { %v701_v41 = vpop.xlane.xlu1 %700 }
 0x492   :  { %v698_v35 = vpop.xlane.xlu0 %697 }
 0x493   :  { %1023 = vrcp.f32 %v698_v35 }
 0x499   :  { %v1024_v38 = vpop.eup %1023 }
 0x49a   :  { %v419_v36 = vpop.xlane.xlu0 %418 }
 0x49b   :  { %1025 = vrcp.f32 %v419_v36 }
 0x4a1   :  { %v1026_v39 = vpop.eup %1025  ;;  %v725_v40 = vpop.f32.mrf.mxu3 }
 0x4a2   :  { %v756_v42 = vmul.f32 %v1024_v38, %v725_v40  ;;  %v284_v43 = vpop.xlane.xlu0 %283  ;;  %v475_v44 = vmul.f32 %v1026_v39, %v469_v37 }
 0x4a3   :  { %1027 = vrcp.f32 %v284_v43  ;;  %v610_v45 = vpop.f32.mrf.mxu1 }
 0x4a4   :  { %760 = vrot.lane.b32.xlu2 %v756_v42, %s1209_s15  ;;  %480 = vrot.lane.b32.xlu0 %v475_v44, %s1192_s30  ;;  %1029 = vrcp.f32 %v701_v41 }
 0x4a8   :  { %v479_v51 = vpop.permute.xlu1 %478 }
 0x4a9   :  { %v1028_v46 = vpop.eup %1027 }
 0x4aa   :  { %v342_v47 = vmul.f32 %v1028_v46, %v1397_v55  ;;  %v560_v48 = vpop.xlane.xlu0 %559  ;;  %v1030_v49 = vpop.eup %1029  ;;  %v870_v46 = vld [vmem:[#allocation11 + $0x10] sm:$0xff] }
 0x4ab   :  { %1031 = vrcp.f32 %v560_v48  ;;  %v751_v50 = vpop.f32.mrf.mxu1  ;;  %895 = vmatpush.msra.mxu0 %v870_v46  ;;  %v993_v48 = vld [vmem:[%s1482_s8] ss:$0 sm:$0xff]  ;;  %s1210_s8 = smov [#allocation12]  }
 0x4ac   :  { %344 = vst.msk [vmem:[#allocation2] sm:$0xff] %vm218_vm8, %v342_v47  ;;  %v757_v52 = vmul.f32 %v1030_v49, %v751_v50  ;;  %v868_v47 = vld [vmem:[#allocation11] sm:$0xff]  ;;  %s915_s20 = sshll.u32 %s1210_s8, 4  ;;  %s916_s20 = int_to_ptr.vmem [resolvable:$true] %s915_s20 }
 0x4ad   :  { %485 = vst.msk [vmem:[#allocation2] sm:$0xff] %vm484_vm9, %v479_v51 }
 0x4ae   :  { %762 = vrot.lane.b32.xlu2 %v757_v52, %s1209_s15 }
 0x4b1   :  { %v1032_v53 = vpop.eup %1031 }
 0x4b2   :  { %v616_v56 = vmul.f32 %v1032_v53, %v610_v45 }
 0x4b4   :  { %621 = vrot.lane.b32.xlu1 %v616_v56, %s1208_s7 }
 0x4d7   :  { %v620_v57 = vpop.permute.xlu0 %619 }
 0x4d8   :  { %626 = vst.msk [vmem:[#allocation2] sm:$0xff] %vm625_vm10, %v620_v57  ;;  %v994_v57 = vld [vmem:[%s1484_s10] ss:$0 sm:$0xff] }
 0x4fe   :  { %v761_v55 = vpop.permute.xlu2 %760 }
 0x4ff   :  { %767 = vst.msk [vmem:[#allocation2] sm:$0xff] %vm766_vm11, %v761_v55 }
 0x506   :  { %v769_v58 = vld [vmem:[#allocation2] sm:$0xff] }
 0x507   :  { %v1430_v59 = vadd.f32 %v769_v58, %v1298_v0 }
 0x508   :  { %v763_v63 = vpop.permute.xlu2 %762 }
 0x509   :  { %v775_v60 = vsel %vm119_vm0, %v1430_v59, 0.0 }
 0x50a   :  { %776 = vadd.xlane.f32.xlu0 %v775_v60 }
 0x516   :  { %v481_v61 = vpop.permute.xlu0 %480 }
 0x517   :  { %486 = vst.msk [vmem:[#allocation2 + $0x8] sm:$0xff] %vm484_vm9, %v481_v61 }
 0x526   :  { %v622_v62 = vpop.permute.xlu1 %621 }
 0x527   :  { %627 = vst.msk [vmem:[#allocation2 + $0x8] sm:$0xff] %vm625_vm10, %v622_v62 }
 0x528   :  { %768 = vst.msk [vmem:[#allocation2 + $0x8] sm:$0xff] %vm766_vm11, %v763_v63 }
 0x52f   :  { %v770_v1 = vld [vmem:[#allocation2 + $0x8] sm:$0xff] }
 0x530   :  { %v1436_v3 = vadd.f32 %v770_v1, %v1302_v2 }
 0x532   :  { %v778_v4 = vsel %vm119_vm0, %v1436_v3, 0.0 }
 0x533   :  { %779 = vadd.xlane.f32.xlu1 %v778_v4 }
 0x57d   :  { %v777_v0 = vpop.xlane.xlu0 %776 }
 0x57e   :  { %v781_v5 = vmul.f32 %v777_v0, %v1306_v10 }
 0x580   :  { %v783_v6 = vsub.f32 %v1430_v59, %v781_v5 }
 0x582   :  { %v785_v7 = vmul.f32 %v783_v6, %v783_v6 }
 0x584   :  { %v787_v8 = vsel %vm119_vm0, %v785_v7, 0.0 }
 0x585   :  { %788 = vadd.xlane.f32.xlu2 %v787_v8 }
 0x5a6   :  { %v780_v11 = vpop.xlane.xlu1 %779 }
 0x5a7   :  { %v782_v12 = vmul.f32 %v780_v11, %v1306_v10 }
 0x5a9   :  { %v784_v13 = vsub.f32 %v1436_v3, %v782_v12 }
 0x5ab   :  { %v786_v2 = vmul.f32 %v784_v13, %v784_v13 }
 0x5ad   :  { %v790_v14 = vsel %vm119_vm0, %v786_v2, 0.0 }
 0x5ae   :  { %791 = vadd.xlane.f32.xlu0 %v790_v14 }
 0x5f8   :  { %v789_v54 = vpop.xlane.xlu2 %788 }
 0x5f9   :  { %v793_v18 = vmul.f32 %v789_v54, %v1306_v10 }
 0x5fb   :  { %v795_v19 = vadd.f32 1e-05, %v793_v18 }
 0x5fd   :  { %1033 = vrsqrt.f32 %v795_v19  ;;  %vm803_vm13 = vweird.f32 %v795_v19 }
 0x603   :  { %v1034_v20 = vpop.eup %1033 }
 0x604   :  { %v798_v21 = vmul.f32 %v1034_v20, %v795_v19  ;;  %vm804_vm12 = vweird.f32 %v1034_v20 }
 0x605   :  { %vm805_vm14 = vmor %vm803_vm13, %vm804_vm12 }
 0x606   :  { %v799_v22 = vmul.f32 %v1034_v20, %v798_v21 }
 0x608   :  { %v800_v23 = vmul.f32 0.5, %v799_v22 }
 0x60a   :  { %v801_v24 = vsub.f32 1.5, %v800_v23 }
 0x60c   :  { %v802_v25 = vmul.f32 %v1034_v20, %v801_v24 }
 0x60e   :  { %v806_v27 = vsel %vm805_vm14, %v1034_v20, %v802_v25 }
 0x60f   :  { %v817_v28 = vmul.f32 %v806_v27, %v783_v6 }
 0x611   :  { %v822_v31 = vmul.f32 %v991_v26, %v817_v28 }
 0x613   :  { %v827_v32 = vadd.f32 %v992_v30, %v822_v31 }
 0x615   :  { %958 = vmatmul.msk.f32.vlgmr.msra.gmra.mxu2 %vm119_vm0, %v827_v32 }
 0x621   :  { %v792_v34 = vpop.xlane.xlu0 %791 }
 0x622   :  { %v794_v29 = vmul.f32 %v792_v34, %v1306_v10  ;;  %v869_v10 = vld [vmem:[#allocation11 + $0x8] sm:$0xff] }
 0x623   :  { %896 = vmatpush.msra.mxu0 %v869_v10 }
 0x624   :  { %v796_v35 = vadd.f32 1e-05, %v794_v29 }
 0x625   :  { %897 = vmatpush.msra.mxu0 %v868_v47 }
 0x626   :  { %1035 = vrsqrt.f32 %v796_v35  ;;  %vm813_vm1 = vweird.f32 %v796_v35 }
 0x62c   :  { %v1036_v36 = vpop.eup %1035 }
 0x62d   :  { %v808_v37 = vmul.f32 %v1036_v36, %v796_v35  ;;  %vm814_vm15 = vweird.f32 %v1036_v36 }
 0x62e   :  { %vm815_vm2 = vmor %vm813_vm1, %vm814_vm15 }
 0x62f   :  { %v809_v38 = vmul.f32 %v1036_v36, %v808_v37 }
 0x631   :  { %v810_v39 = vmul.f32 0.5, %v809_v38 }
 0x633   :  { %v811_v40 = vsub.f32 1.5, %v810_v39 }
 0x635   :  { %v812_v41 = vmul.f32 %v1036_v36, %v811_v40 }
 0x637   :  { %v816_v42 = vsel %vm815_vm2, %v1036_v36, %v812_v41 }
 0x638   :  { %v818_v43 = vmul.f32 %v816_v42, %v784_v13 }
 0x63a   :  { %v823_v44 = vmul.f32 %v991_v26, %v818_v43 }
 0x63c   :  { %v828_v45 = vadd.f32 %v992_v30, %v823_v44 }
 0x63e   :  { %959 = vmatmul.msk.f32.gmra.mxu2 %vm119_vm0, %v828_v45 }
 0x698   :  { %v860_v49 = vpop.f32.mrf.mxu2 }
 0x699   :  { %v861_v50 = vadd.f32 %v993_v48, %v860_v49 }
 0x69b   :  { %v866_v51 = vmax.f32 %v861_v50, 0.0 }
 0x69d   :  { %960 = vmatmul.msk.f32.vlgmr.msra.gmra.mxu0 %vm119_vm0, %v866_v51 }
 0x6c1   :  { %v863_v52 = vpop.f32.mrf.mxu2 }
 0x6c2   :  { %v864_v53 = vadd.f32 %v993_v48, %v863_v52 }
 0x6c4   :  { %v867_v56 = vmax.f32 %v864_v53, 0.0 }
 0x6c6   :  { %961 = vmatmul.msk.f32.gmra.mxu0 %vm119_vm0, %v867_v56 }
 0x71a   :  { %v899_v55 = vpop.f32.mrf.mxu0 }
 0x71b   :  { %v900_v58 = vadd.f32 %v994_v57, %v899_v55 }
 0x71d   :  { %v905_v60 = vmax.f32 %v900_v58, 0.0 }
 0x71f   :  { %v907_v61 = vadd.f32 %v905_v60, %v1430_v59 }
 0x721   :  { %909 = vst.msk [vmem:[#allocation12] sm:$0xff] %vm119_vm0, %v907_v61 }
 0x743   :  { %v902_v62 = vpop.f32.mrf.mxu0 }
 0x744   :  { %v903_v63 = vadd.f32 %v994_v57, %v902_v62 }
 0x746   :  { %v906_v1 = vmax.f32 %v903_v63, 0.0 }
 0x748   :  { %v908_v4 = vadd.f32 %v906_v1, %v1436_v3 }
 0x74a   :  { %910 = vst.msk [vmem:[#allocation12 + $0x8] sm:$0xff] %vm119_vm0, %v908_v4 }
 0x74b   :  { %923 = dma.vmem_to_hbm [thread:$0]  %s916_s20, 256, %s918_s22, [#allocation5], %s1191_s1, %s1191_s1, %s1192_s30  }
 0x74c   :  { %1187 = dma.done.wait [#allocation5], 256  }
 0x74d   :  { %1188 = vsyncadd [#allocation5], 4294967040 }
 0x74e   :  { %928 = vsyncpa [#allocation4], 1 }
 0x74f   :  { %929 = vsyncpa [#allocation7], 1 }
 0x750   :  { %930 = vsyncpa [#allocation10], 1 }
 0x751   :  { %931 = vsyncpa [#allocation5], 1 }

</bundles_post_ra>
